<compile_context>
chip_gen: v7x
topology: tpu7x:2x2x1
jax: 0.10.0
libtpu: 0.0.40
codegen_flags: <defaults>
</compile_context>

<pallas_src>
import functools

import jax
import jax.numpy as jnp
from jax.experimental import pallas as pl
from jax.experimental.pallas import tpu as pltpu


def _corr_loss_kernel(pred_ref, real_ref, out_ref,
                      p_cnt, p_sum, p_sq,
                      r_cnt, r_sum, r_sq,
                      p_pln, r_pln, x_sum,
                      *, num_rows, block_rows):
    i = pl.program_id(0)

    @pl.when(i == 0)
    def _init():
        for ref in (p_cnt, p_sum, p_sq, r_cnt, r_sum, r_sq, p_pln, r_pln, x_sum):
            ref[...] = jnp.zeros_like(ref)

    pred = pred_ref[...].astype(jnp.float32)
    real = real_ref[...].astype(jnp.float32)

    # Mask rows past the true end of the array (partial last tile).
    row = jax.lax.broadcasted_iota(jnp.int32, pred.shape, 0) + i * block_rows
    in_bounds = row < num_rows

    # Boolean NaN masks (no f32 materialization except for the count sums).
    pm = jnp.logical_and(in_bounds, jnp.logical_not(jnp.isnan(pred)))
    rm = jnp.logical_and(in_bounds, jnp.logical_not(jnp.isnan(real)))
    pz = jnp.where(pm, pred, 0.0)
    rz = jnp.where(rm, real, 0.0)

    # NaN-masked per-column sufficient statistics (for nanmean / nanstd).
    p_cnt[...] += jnp.sum(pm.astype(jnp.float32), axis=0, keepdims=True)
    p_sum[...] += jnp.sum(pz, axis=0, keepdims=True)
    p_sq[...] += jnp.sum(pz * pz, axis=0, keepdims=True)
    r_cnt[...] += jnp.sum(rm.astype(jnp.float32), axis=0, keepdims=True)
    r_sum[...] += jnp.sum(rz, axis=0, keepdims=True)
    r_sq[...] += jnp.sum(rz * rz, axis=0, keepdims=True)

    # Plain (NaN-propagating) sums for the final covariance term
    # (the reference uses th.mean there, not nanmean).
    pv = jnp.where(in_bounds, pred, 0.0)
    rv = jnp.where(in_bounds, real, 0.0)
    p_pln[...] += jnp.sum(pv, axis=0, keepdims=True)
    r_pln[...] += jnp.sum(rv, axis=0, keepdims=True)
    x_sum[...] += jnp.sum(pv * rv, axis=0, keepdims=True)

    @pl.when(i == pl.num_programs(0) - 1)
    def _finalize():
        n_cols = pred_ref.shape[1]
        n_total = jnp.float32(num_rows * n_cols)  # plain-mean element count

        pc = jnp.sum(p_cnt[...])
        rc = jnp.sum(r_cnt[...])
        mean_yhat = jnp.sum(p_sum[...]) / pc
        mean_y = jnp.sum(r_sum[...]) / rc

        # sum over valid elements of (x - per-column nanmean(x))**2 from the
        # per-column sufficient statistics: sum_c [S2_c - S1_c^2 / cnt_c].
        # All-NaN columns contribute nothing (matches the reference, whose NaN
        # deviations are dropped by the global nanmean).
        p_dev = jnp.maximum(
            jnp.where(p_cnt[...] > 0.0,
                      p_sq[...] - p_sum[...] * p_sum[...] / p_cnt[...], 0.0), 0.0)
        r_dev = jnp.maximum(
            jnp.where(r_cnt[...] > 0.0,
                      r_sq[...] - r_sum[...] * r_sum[...] / r_cnt[...], 0.0), 0.0)
        std_yhat = jnp.sqrt(jnp.sum(p_dev) / pc)
        std_y = jnp.sqrt(jnp.sum(r_dev) / rc)

        # mean((pred - mean_yhat)*(real - mean_y)) expanded with plain sums;
        # the divide by (std_yhat * std_y * N) is a single scalar op here
        # instead of an elementwise divide over the whole array.
        sp = jnp.sum(p_pln[...])
        sr = jnp.sum(r_pln[...])
        sx = jnp.sum(x_sum[...])
        cov_sum = sx - mean_y * sp - mean_yhat * sr + n_total * mean_yhat * mean_y
        loss = 1.0 - cov_sum / (std_yhat * std_y * n_total)

        # TODO(synk): the PyTorch branch also prints a warning when a std is
        # zero; only the value semantics (return 0.0) are reproduced here.
        degenerate = jnp.logical_or(std_y == 0.0, std_yhat == 0.0)
        out_ref[0] = jnp.where(degenerate, jnp.float32(0.0), loss)


def corr_loss(pred, real, *, block_rows=None):
    """Pearson correlation loss; single streaming pass over row tiles."""
    assert pred.shape == real.shape and pred.ndim == 2, (pred.shape, real.shape)
    R, C = pred.shape

    # Tile sizing: <=~4 MiB per f32 input buffer so 2 inputs x 2 pipeline
    # buffers + scratch stay well inside default scoped VMEM on v5e/v6e/v7x.
    # TODO(synk): on v7x a leading size-2 "parallel" axis (one per TensorCore)
    # with a tiny combine epilogue could use both cores; single-core here.
    if block_rows is None:
        block_rows = max(8, min(512, (1 << 20) // max(C, 1)))
    tm = min(block_rows, R)
    if tm < R:
        tm = max(8, (tm // 8) * 8)  # sublane-aligned row tiles when tiling
    n_tiles = pl.cdiv(R, tm)

    kernel = functools.partial(_corr_loss_kernel, num_rows=R, block_rows=tm)
    out = pl.pallas_call(
        kernel,
        out_shape=jax.ShapeDtypeStruct((1,), jnp.float32),
        grid=(n_tiles,),
        in_specs=[
            pl.BlockSpec((tm, C), lambda i: (i, 0)),
            pl.BlockSpec((tm, C), lambda i: (i, 0)),
        ],
        out_specs=pl.BlockSpec(memory_space=pltpu.SMEM),
        scratch_shapes=[pltpu.VMEM((1, C), jnp.float32) for _ in range(9)],
        compiler_params=pltpu.CompilerParams(
            dimension_semantics=("arbitrary",)),
    )(pred, real)  # no wrapper-side casts: inputs stream at native dtype
    return out[0]


def _reference(pred, real):
    """Pure-JAX reference mirroring the PyTorch code (sanity check)."""
    def nanmean(x, axis=None, keepdims=False):
        m = ~jnp.isnan(x)
        return (jnp.sum(jnp.where(m, x, 0.0), axis=axis, keepdims=keepdims)
                / jnp.sum(m, axis=axis, keepdims=keepdims))

    def nanstd(x):
        return jnp.sqrt(nanmean((x - nanmean(x, axis=0, keepdims=True)) ** 2))

    mean_y, std_y = nanmean(real), nanstd(real)
    mean_yhat, std_yhat = nanmean(pred), nanstd(pred)
    return 1.0 - jnp.mean((pred - mean_yhat) * (real - mean_y) / (std_yhat * std_y))


if __name__ == "__main__":
    key = jax.random.PRNGKey(0)
    k1, k2, k3, k4 = jax.random.split(key, 4)

    # --- test 1: small shape, several row tiles + a partial (masked) last tile
    R, C = 72, 128
    real = jax.random.normal(k1, (R, C), dtype=jnp.float32)
    pred = 0.7 * real + 0.3 * jax.random.normal(k2, (R, C), dtype=jnp.float32)
    loss = corr_loss(pred, real, block_rows=16)   # 5 tiles, last one half-valid
    jax.block_until_ready(loss)
    ref = _reference(pred, real)
    assert jnp.allclose(loss, ref, atol=1e-5, rtol=1e-5), (loss, ref)

    # --- test 2: default tiling (512-row tiles), larger shape
    R2, C2 = 1024, 256
    real2 = jax.random.normal(k3, (R2, C2), dtype=jnp.float32)
    pred2 = 0.5 * real2 + 0.5 * jax.random.normal(k4, (R2, C2), dtype=jnp.float32)
    loss2 = corr_loss(pred2, real2)
    jax.block_until_ready(loss2)
    ref2 = _reference(pred2, real2)
    assert jnp.allclose(loss2, ref2, atol=1e-4, rtol=1e-4), (loss2, ref2)

    # --- test 3: NaN masking + degenerate-std path (constant pred -> std 0)
    pred3 = jnp.ones((R, C), jnp.float32).at[3, 7].set(jnp.nan).at[11, 0].set(jnp.nan)
    loss3 = corr_loss(pred3, real, block_rows=16)
    jax.block_until_ready(loss3)
    assert jnp.allclose(loss3, 0.0), loss3   # std_yhat == 0 -> reference returns 0.0

    # --- test 4: all-NaN column dropped by nanmean, per-column-constant real -> std_y == 0
    real4 = jnp.broadcast_to(jnp.arange(C, dtype=jnp.float32)[None, :], (R, C))
    real4 = real4.at[:, 5].set(jnp.nan)      # whole column NaN
    loss4 = corr_loss(pred, real4, block_rows=16)
    jax.block_until_ready(loss4)
    assert jnp.allclose(loss4, 0.0), loss4   # std_y == 0 -> 0.0

    # --- test 5: bf16 inputs stream natively (no wrapper cast), f32 accumulation
    loss5 = corr_loss(pred.astype(jnp.bfloat16), real.astype(jnp.bfloat16),
                      block_rows=32)
    jax.block_until_ready(loss5)
    ref5 = _reference(pred.astype(jnp.bfloat16).astype(jnp.float32),
                      real.astype(jnp.bfloat16).astype(jnp.float32))
    assert jnp.allclose(loss5, ref5, atol=1e-3, rtol=1e-3), (loss5, ref5)

    print("KERNEL_OK")
</pallas_src>

<mosaic_0001>
module attributes {stable_mosaic.version = 11 : i64} {
  func.func @_corr_loss_kernel(%arg0: i32, %arg1: memref<16x128xf32, #tpu.memory_space<vmem>>, %arg2: memref<16x128xf32, #tpu.memory_space<vmem>>, %arg3: memref<1xf32, #tpu.memory_space<smem>>, %arg4: memref<1x128xf32, #tpu.memory_space<vmem>>, %arg5: memref<1x128xf32, #tpu.memory_space<vmem>>, %arg6: memref<1x128xf32, #tpu.memory_space<vmem>>, %arg7: memref<1x128xf32, #tpu.memory_space<vmem>>, %arg8: memref<1x128xf32, #tpu.memory_space<vmem>>, %arg9: memref<1x128xf32, #tpu.memory_space<vmem>>, %arg10: memref<1x128xf32, #tpu.memory_space<vmem>>, %arg11: memref<1x128xf32, #tpu.memory_space<vmem>>, %arg12: memref<1x128xf32, #tpu.memory_space<vmem>>) attributes {dimension_semantics = [#tpu.dimension_semantics<arbitrary>], iteration_bounds = array<i64: 5>, scalar_prefetch = 0 : i64, scratch_operands = 9 : i64, tpu.core_type = #tpu.core_type<tc>, window_params = [{transform_indices = @transform_0, window_bounds = array<i64: 16, 128>}, {transform_indices = @transform_1, window_bounds = array<i64: 16, 128>}, {transform_indices = @transform_2, window_bounds = array<i64: 1>}]} {
    %c0_i32 = arith.constant 0 : i32
    %0 = arith.cmpi eq, %arg0, %c0_i32 : i32
    %1 = arith.extui %0 : i1 to i32
    %c0_i32_0 = arith.constant 0 : i32
    %2 = arith.cmpi ne, %1, %c0_i32_0 : i32
    scf.if %2 {
      %cst_55 = arith.constant 0.000000e+00 : f32
      %80 = vector.broadcast %cst_55 : f32 to vector<1x128xf32>
      %c0_56 = arith.constant 0 : index
      %c0_57 = arith.constant 0 : index
      %81 = vector.load %arg4[%c0_56, %c0_57] : memref<1x128xf32, #tpu.memory_space<vmem>>, vector<1x128xf32>
      tpu.vector_store %arg4[%c0_56, %c0_57], %80 {strides = array<i32>} : memref<1x128xf32, #tpu.memory_space<vmem>>, vector<1x128xf32>,
      %cst_58 = arith.constant 0.000000e+00 : f32
      %82 = vector.broadcast %cst_58 : f32 to vector<1x128xf32>
      %c0_59 = arith.constant 0 : index
      %c0_60 = arith.constant 0 : index
      %83 = vector.load %arg5[%c0_59, %c0_60] : memref<1x128xf32, #tpu.memory_space<vmem>>, vector<1x128xf32>
      tpu.vector_store %arg5[%c0_59, %c0_60], %82 {strides = array<i32>} : memref<1x128xf32, #tpu.memory_space<vmem>>, vector<1x128xf32>,
      %cst_61 = arith.constant 0.000000e+00 : f32
      %84 = vector.broadcast %cst_61 : f32 to vector<1x128xf32>
      %c0_62 = arith.constant 0 : index
      %c0_63 = arith.constant 0 : index
      %85 = vector.load %arg6[%c0_62, %c0_63] : memref<1x128xf32, #tpu.memory_space<vmem>>, vector<1x128xf32>
      tpu.vector_store %arg6[%c0_62, %c0_63], %84 {strides = array<i32>} : memref<1x128xf32, #tpu.memory_space<vmem>>, vector<1x128xf32>,
      %cst_64 = arith.constant 0.000000e+00 : f32
      %86 = vector.broadcast %cst_64 : f32 to vector<1x128xf32>
      %c0_65 = arith.constant 0 : index
      %c0_66 = arith.constant 0 : index
      %87 = vector.load %arg7[%c0_65, %c0_66] : memref<1x128xf32, #tpu.memory_space<vmem>>, vector<1x128xf32>
      tpu.vector_store %arg7[%c0_65, %c0_66], %86 {strides = array<i32>} : memref<1x128xf32, #tpu.memory_space<vmem>>, vector<1x128xf32>,
      %cst_67 = arith.constant 0.000000e+00 : f32
      %88 = vector.broadcast %cst_67 : f32 to vector<1x128xf32>
      %c0_68 = arith.constant 0 : index
      %c0_69 = arith.constant 0 : index
      %89 = vector.load %arg8[%c0_68, %c0_69] : memref<1x128xf32, #tpu.memory_space<vmem>>, vector<1x128xf32>
      tpu.vector_store %arg8[%c0_68, %c0_69], %88 {strides = array<i32>} : memref<1x128xf32, #tpu.memory_space<vmem>>, vector<1x128xf32>,
      %cst_70 = arith.constant 0.000000e+00 : f32
      %90 = vector.broadcast %cst_70 : f32 to vector<1x128xf32>
      %c0_71 = arith.constant 0 : index
      %c0_72 = arith.constant 0 : index
      %91 = vector.load %arg9[%c0_71, %c0_72] : memref<1x128xf32, #tpu.memory_space<vmem>>, vector<1x128xf32>
      tpu.vector_store %arg9[%c0_71, %c0_72], %90 {strides = array<i32>} : memref<1x128xf32, #tpu.memory_space<vmem>>, vector<1x128xf32>,
      %cst_73 = arith.constant 0.000000e+00 : f32
      %92 = vector.broadcast %cst_73 : f32 to vector<1x128xf32>
      %c0_74 = arith.constant 0 : index
      %c0_75 = arith.constant 0 : index
      %93 = vector.load %arg10[%c0_74, %c0_75] : memref<1x128xf32, #tpu.memory_space<vmem>>, vector<1x128xf32>
      tpu.vector_store %arg10[%c0_74, %c0_75], %92 {strides = array<i32>} : memref<1x128xf32, #tpu.memory_space<vmem>>, vector<1x128xf32>,
      %cst_76 = arith.constant 0.000000e+00 : f32
      %94 = vector.broadcast %cst_76 : f32 to vector<1x128xf32>
      %c0_77 = arith.constant 0 : index
      %c0_78 = arith.constant 0 : index
      %95 = vector.load %arg11[%c0_77, %c0_78] : memref<1x128xf32, #tpu.memory_space<vmem>>, vector<1x128xf32>
      tpu.vector_store %arg11[%c0_77, %c0_78], %94 {strides = array<i32>} : memref<1x128xf32, #tpu.memory_space<vmem>>, vector<1x128xf32>,
      %cst_79 = arith.constant 0.000000e+00 : f32
      %96 = vector.broadcast %cst_79 : f32 to vector<1x128xf32>
      %c0_80 = arith.constant 0 : index
      %c0_81 = arith.constant 0 : index
      %97 = vector.load %arg12[%c0_80, %c0_81] : memref<1x128xf32, #tpu.memory_space<vmem>>, vector<1x128xf32>
      tpu.vector_store %arg12[%c0_80, %c0_81], %96 {strides = array<i32>} : memref<1x128xf32, #tpu.memory_space<vmem>>, vector<1x128xf32>,
    } else {
    }
    %c0 = arith.constant 0 : index
    %c0_1 = arith.constant 0 : index
    %3 = vector.load %arg1[%c0, %c0_1] : memref<16x128xf32, #tpu.memory_space<vmem>>, vector<16x128xf32>
    %c0_2 = arith.constant 0 : index
    %c0_3 = arith.constant 0 : index
    %4 = vector.load %arg2[%c0_2, %c0_3] : memref<16x128xf32, #tpu.memory_space<vmem>>, vector<16x128xf32>
    %5 = tpu.iota {dimensions = array<i32: 0>} : vector<16x128xi32>
    %c16_i32 = arith.constant 16 : i32
    %6 = arith.muli %arg0, %c16_i32 : i32
    %7 = vector.broadcast %6 : i32 to vector<16x128xi32>
    %8 = arith.addi %5, %7 : vector<16x128xi32>
    %c72_i32 = arith.constant 72 : i32
    %9 = vector.broadcast %c72_i32 : i32 to vector<16x128xi32>
    %10 = arith.cmpi slt, %8, %9 : vector<16x128xi32>
    %11 = arith.cmpf one, %3, %3 : vector<16x128xf32>
    %cst = arith.constant dense<true> : vector<16x128xi1>
    %12 = arith.xori %11, %cst : vector<16x128xi1>
    %13 = arith.andi %10, %12 : vector<16x128xi1>
    %14 = arith.cmpf one, %4, %4 : vector<16x128xf32>
    %cst_4 = arith.constant dense<true> : vector<16x128xi1>
    %15 = arith.xori %14, %cst_4 : vector<16x128xi1>
    %16 = arith.andi %10, %15 : vector<16x128xi1>
    %cst_5 = arith.constant 0.000000e+00 : f32
    %17 = vector.broadcast %cst_5 : f32 to vector<16x128xf32>
    %18 = arith.select %13, %3, %17 : vector<16x128xi1>, vector<16x128xf32>
    %cst_6 = arith.constant 0.000000e+00 : f32
    %19 = vector.broadcast %cst_6 : f32 to vector<16x128xf32>
    %20 = arith.select %16, %4, %19 : vector<16x128xi1>, vector<16x128xf32>
    %c0_7 = arith.constant 0 : index
    %c0_8 = arith.constant 0 : index
    %21 = vector.load %arg4[%c0_7, %c0_8] : memref<1x128xf32, #tpu.memory_space<vmem>>, vector<1x128xf32>
    %22 = arith.extui %13 : vector<16x128xi1> to vector<16x128xi32>
    %23 = arith.sitofp %22 : vector<16x128xi32> to vector<16x128xf32>
    %cst_9 = arith.constant dense<0.000000e+00> : vector<128xf32>
    %24 = vector.multi_reduction <add>, %23, %cst_9 [0] : vector<16x128xf32> to vector<128xf32>
    %25 = vector.shape_cast %24 : vector<128xf32> to vector<1x128xf32>
    %26 = arith.addf %21, %25 : vector<1x128xf32>
    %c0_10 = arith.constant 0 : index
    %c0_11 = arith.constant 0 : index
    %27 = vector.load %arg4[%c0_10, %c0_11] : memref<1x128xf32, #tpu.memory_space<vmem>>, vector<1x128xf32>
    tpu.vector_store %arg4[%c0_10, %c0_11], %26 {strides = array<i32>} : memref<1x128xf32, #tpu.memory_space<vmem>>, vector<1x128xf32>,
    %c0_12 = arith.constant 0 : index
    %c0_13 = arith.constant 0 : index
    %28 = vector.load %arg5[%c0_12, %c0_13] : memref<1x128xf32, #tpu.memory_space<vmem>>, vector<1x128xf32>
    %cst_14 = arith.constant dense<0.000000e+00> : vector<128xf32>
    %29 = vector.multi_reduction <add>, %18, %cst_14 [0] : vector<16x128xf32> to vector<128xf32>
    %30 = vector.shape_cast %29 : vector<128xf32> to vector<1x128xf32>
    %31 = arith.addf %28, %30 : vector<1x128xf32>
    %c0_15 = arith.constant 0 : index
    %c0_16 = arith.constant 0 : index
    %32 = vector.load %arg5[%c0_15, %c0_16] : memref<1x128xf32, #tpu.memory_space<vmem>>, vector<1x128xf32>
    tpu.vector_store %arg5[%c0_15, %c0_16], %31 {strides = array<i32>} : memref<1x128xf32, #tpu.memory_space<vmem>>, vector<1x128xf32>,
    %c0_17 = arith.constant 0 : index
    %c0_18 = arith.constant 0 : index
    %33 = vector.load %arg6[%c0_17, %c0_18] : memref<1x128xf32, #tpu.memory_space<vmem>>, vector<1x128xf32>
    %34 = arith.mulf %18, %18 : vector<16x128xf32>
    %cst_19 = arith.constant dense<0.000000e+00> : vector<128xf32>
    %35 = vector.multi_reduction <add>, %34, %cst_19 [0] : vector<16x128xf32> to vector<128xf32>
    %36 = vector.shape_cast %35 : vector<128xf32> to vector<1x128xf32>
    %37 = arith.addf %33, %36 : vector<1x128xf32>
    %c0_20 = arith.constant 0 : index
    %c0_21 = arith.constant 0 : index
    %38 = vector.load %arg6[%c0_20, %c0_21] : memref<1x128xf32, #tpu.memory_space<vmem>>, vector<1x128xf32>
    tpu.vector_store %arg6[%c0_20, %c0_21], %37 {strides = array<i32>} : memref<1x128xf32, #tpu.memory_space<vmem>>, vector<1x128xf32>,
    %c0_22 = arith.constant 0 : index
    %c0_23 = arith.constant 0 : index
    %39 = vector.load %arg7[%c0_22, %c0_23] : memref<1x128xf32, #tpu.memory_space<vmem>>, vector<1x128xf32>
    %40 = arith.extui %16 : vector<16x128xi1> to vector<16x128xi32>
    %41 = arith.sitofp %40 : vector<16x128xi32> to vector<16x128xf32>
    %cst_24 = arith.constant dense<0.000000e+00> : vector<128xf32>
    %42 = vector.multi_reduction <add>, %41, %cst_24 [0] : vector<16x128xf32> to vector<128xf32>
    %43 = vector.shape_cast %42 : vector<128xf32> to vector<1x128xf32>
    %44 = arith.addf %39, %43 : vector<1x128xf32>
    %c0_25 = arith.constant 0 : index
    %c0_26 = arith.constant 0 : index
    %45 = vector.load %arg7[%c0_25, %c0_26] : memref<1x128xf32, #tpu.memory_space<vmem>>, vector<1x128xf32>
    tpu.vector_store %arg7[%c0_25, %c0_26], %44 {strides = array<i32>} : memref<1x128xf32, #tpu.memory_space<vmem>>, vector<1x128xf32>,
    %c0_27 = arith.constant 0 : index
    %c0_28 = arith.constant 0 : index
    %46 = vector.load %arg8[%c0_27, %c0_28] : memref<1x128xf32, #tpu.memory_space<vmem>>, vector<1x128xf32>
    %cst_29 = arith.constant dense<0.000000e+00> : vector<128xf32>
    %47 = vector.multi_reduction <add>, %20, %cst_29 [0] : vector<16x128xf32> to vector<128xf32>
    %48 = vector.shape_cast %47 : vector<128xf32> to vector<1x128xf32>
    %49 = arith.addf %46, %48 : vector<1x128xf32>
    %c0_30 = arith.constant 0 : index
    %c0_31 = arith.constant 0 : index
    %50 = vector.load %arg8[%c0_30, %c0_31] : memref<1x128xf32, #tpu.memory_space<vmem>>, vector<1x128xf32>
    tpu.vector_store %arg8[%c0_30, %c0_31], %49 {strides = array<i32>} : memref<1x128xf32, #tpu.memory_space<vmem>>, vector<1x128xf32>,
    %c0_32 = arith.constant 0 : index
    %c0_33 = arith.constant 0 : index
    %51 = vector.load %arg9[%c0_32, %c0_33] : memref<1x128xf32, #tpu.memory_space<vmem>>, vector<1x128xf32>
    %52 = arith.mulf %20, %20 : vector<16x128xf32>
    %cst_34 = arith.constant dense<0.000000e+00> : vector<128xf32>
    %53 = vector.multi_reduction <add>, %52, %cst_34 [0] : vector<16x128xf32> to vector<128xf32>
    %54 = vector.shape_cast %53 : vector<128xf32> to vector<1x128xf32>
    %55 = arith.addf %51, %54 : vector<1x128xf32>
    %c0_35 = arith.constant 0 : index
    %c0_36 = arith.constant 0 : index
    %56 = vector.load %arg9[%c0_35, %c0_36] : memref<1x128xf32, #tpu.memory_space<vmem>>, vector<1x128xf32>
    tpu.vector_store %arg9[%c0_35, %c0_36], %55 {strides = array<i32>} : memref<1x128xf32, #tpu.memory_space<vmem>>, vector<1x128xf32>,
    %cst_37 = arith.constant 0.000000e+00 : f32
    %57 = vector.broadcast %cst_37 : f32 to vector<16x128xf32>
    %58 = arith.select %10, %3, %57 : vector<16x128xi1>, vector<16x128xf32>
    %cst_38 = arith.constant 0.000000e+00 : f32
    %59 = vector.broadcast %cst_38 : f32 to vector<16x128xf32>
    %60 = arith.select %10, %4, %59 : vector<16x128xi1>, vector<16x128xf32>
    %c0_39 = arith.constant 0 : index
    %c0_40 = arith.constant 0 : index
    %61 = vector.load %arg10[%c0_39, %c0_40] : memref<1x128xf32, #tpu.memory_space<vmem>>, vector<1x128xf32>
    %cst_41 = arith.constant dense<0.000000e+00> : vector<128xf32>
    %62 = vector.multi_reduction <add>, %58, %cst_41 [0] : vector<16x128xf32> to vector<128xf32>
    %63 = vector.shape_cast %62 : vector<128xf32> to vector<1x128xf32>
    %64 = arith.addf %61, %63 : vector<1x128xf32>
    %c0_42 = arith.constant 0 : index
    %c0_43 = arith.constant 0 : index
    %65 = vector.load %arg10[%c0_42, %c0_43] : memref<1x128xf32, #tpu.memory_space<vmem>>, vector<1x128xf32>
    tpu.vector_store %arg10[%c0_42, %c0_43], %64 {strides = array<i32>} : memref<1x128xf32, #tpu.memory_space<vmem>>, vector<1x128xf32>,
    %c0_44 = arith.constant 0 : index
    %c0_45 = arith.constant 0 : index
    %66 = vector.load %arg11[%c0_44, %c0_45] : memref<1x128xf32, #tpu.memory_space<vmem>>, vector<1x128xf32>
    %cst_46 = arith.constant dense<0.000000e+00> : vector<128xf32>
    %67 = vector.multi_reduction <add>, %60, %cst_46 [0] : vector<16x128xf32> to vector<128xf32>
    %68 = vector.shape_cast %67 : vector<128xf32> to vector<1x128xf32>
    %69 = arith.addf %66, %68 : vector<1x128xf32>
    %c0_47 = arith.constant 0 : index
    %c0_48 = arith.constant 0 : index
    %70 = vector.load %arg11[%c0_47, %c0_48] : memref<1x128xf32, #tpu.memory_space<vmem>>, vector<1x128xf32>
    tpu.vector_store %arg11[%c0_47, %c0_48], %69 {strides = array<i32>} : memref<1x128xf32, #tpu.memory_space<vmem>>, vector<1x128xf32>,
    %c0_49 = arith.constant 0 : index
    %c0_50 = arith.constant 0 : index
    %71 = vector.load %arg12[%c0_49, %c0_50] : memref<1x128xf32, #tpu.memory_space<vmem>>, vector<1x128xf32>
    %72 = arith.mulf %58, %60 : vector<16x128xf32>
    %cst_51 = arith.constant dense<0.000000e+00> : vector<128xf32>
    %73 = vector.multi_reduction <add>, %72, %cst_51 [0] : vector<16x128xf32> to vector<128xf32>
    %74 = vector.shape_cast %73 : vector<128xf32> to vector<1x128xf32>
    %75 = arith.addf %71, %74 : vector<1x128xf32>
    %c0_52 = arith.constant 0 : index
    %c0_53 = arith.constant 0 : index
    %76 = vector.load %arg12[%c0_52, %c0_53] : memref<1x128xf32, #tpu.memory_space<vmem>>, vector<1x128xf32>
    tpu.vector_store %arg12[%c0_52, %c0_53], %75 {strides = array<i32>} : memref<1x128xf32, #tpu.memory_space<vmem>>, vector<1x128xf32>,
    %c4_i32 = arith.constant 4 : i32
    %77 = arith.cmpi eq, %arg0, %c4_i32 : i32
    %78 = arith.extui %77 : i1 to i32
    %c0_i32_54 = arith.constant 0 : i32
    %79 = arith.cmpi ne, %78, %c0_i32_54 : i32
    scf.if %79 {
      %c0_55 = arith.constant 0 : index
      %c0_56 = arith.constant 0 : index
      %80 = vector.load %arg4[%c0_55, %c0_56] : memref<1x128xf32, #tpu.memory_space<vmem>>, vector<1x128xf32>
      %81 = vector.shape_cast %80 : vector<1x128xf32> to vector<1x1x128xf32>
      %cst_57 = arith.constant dense<0.000000e+00> : vector<1xf32>
      %82 = vector.multi_reduction <add>, %81, %cst_57 [1, 2] : vector<1x1x128xf32> to vector<1xf32>
      %83 = vector.shape_cast %82 : vector<1xf32> to vector<1x1x1xf32>
      %84 = vector.extract %83[0, 0, 0] : f32 from vector<1x1x1xf32>
      %c0_58 = arith.constant 0 : index
      %c0_59 = arith.constant 0 : index
      %85 = vector.load %arg7[%c0_58, %c0_59] : memref<1x128xf32, #tpu.memory_space<vmem>>, vector<1x128xf32>
      %86 = vector.shape_cast %85 : vector<1x128xf32> to vector<1x1x128xf32>
      %cst_60 = arith.constant dense<0.000000e+00> : vector<1xf32>
      %87 = vector.multi_reduction <add>, %86, %cst_60 [1, 2] : vector<1x1x128xf32> to vector<1xf32>
      %88 = vector.shape_cast %87 : vector<1xf32> to vector<1x1x1xf32>
      %89 = vector.extract %88[0, 0, 0] : f32 from vector<1x1x1xf32>
      %c0_61 = arith.constant 0 : index
      %c0_62 = arith.constant 0 : index
      %90 = vector.load %arg5[%c0_61, %c0_62] : memref<1x128xf32, #tpu.memory_space<vmem>>, vector<1x128xf32>
      %91 = vector.shape_cast %90 : vector<1x128xf32> to vector<1x1x128xf32>
      %cst_63 = arith.constant dense<0.000000e+00> : vector<1xf32>
      %92 = vector.multi_reduction <add>, %91, %cst_63 [1, 2] : vector<1x1x128xf32> to vector<1xf32>
      %93 = vector.shape_cast %92 : vector<1xf32> to vector<1x1x1xf32>
      %94 = vector.extract %93[0, 0, 0] : f32 from vector<1x1x1xf32>
      %95 = arith.divf %94, %84 : f32
      %c0_64 = arith.constant 0 : index
      %c0_65 = arith.constant 0 : index
      %96 = vector.load %arg8[%c0_64, %c0_65] : memref<1x128xf32, #tpu.memory_space<vmem>>, vector<1x128xf32>
      %97 = vector.shape_cast %96 : vector<1x128xf32> to vector<1x1x128xf32>
      %cst_66 = arith.constant dense<0.000000e+00> : vector<1xf32>
      %98 = vector.multi_reduction <add>, %97, %cst_66 [1, 2] : vector<1x1x128xf32> to vector<1xf32>
      %99 = vector.shape_cast %98 : vector<1xf32> to vector<1x1x1xf32>
      %100 = vector.extract %99[0, 0, 0] : f32 from vector<1x1x1xf32>
      %101 = arith.divf %100, %89 : f32
      %c0_67 = arith.constant 0 : index
      %c0_68 = arith.constant 0 : index
      %102 = vector.load %arg4[%c0_67, %c0_68] : memref<1x128xf32, #tpu.memory_space<vmem>>, vector<1x128xf32>
      %cst_69 = arith.constant 0.000000e+00 : f32
      %103 = vector.broadcast %cst_69 : f32 to vector<1x128xf32>
      %104 = arith.cmpf ogt, %102, %103 : vector<1x128xf32>
      %c0_70 = arith.constant 0 : index
      %c0_71 = arith.constant 0 : index
      %105 = vector.load %arg6[%c0_70, %c0_71] : memref<1x128xf32, #tpu.memory_space<vmem>>, vector<1x128xf32>
      %c0_72 = arith.constant 0 : index
      %c0_73 = arith.constant 0 : index
      %106 = vector.load %arg5[%c0_72, %c0_73] : memref<1x128xf32, #tpu.memory_space<vmem>>, vector<1x128xf32>
      %c0_74 = arith.constant 0 : index
      %c0_75 = arith.constant 0 : index
      %107 = vector.load %arg5[%c0_74, %c0_75] : memref<1x128xf32, #tpu.memory_space<vmem>>, vector<1x128xf32>
      %108 = arith.mulf %106, %107 : vector<1x128xf32>
      %c0_76 = arith.constant 0 : index
      %c0_77 = arith.constant 0 : index
      %109 = vector.load %arg4[%c0_76, %c0_77] : memref<1x128xf32, #tpu.memory_space<vmem>>, vector<1x128xf32>
      %110 = arith.divf %108, %109 : vector<1x128xf32>
      %111 = arith.subf %105, %110 : vector<1x128xf32>
      %cst_78 = arith.constant 0.000000e+00 : f32
      %112 = vector.broadcast %cst_78 : f32 to vector<1x128xf32>
      %113 = arith.select %104, %111, %112 : vector<1x128xi1>, vector<1x128xf32>
      %cst_79 = arith.constant 0.000000e+00 : f32
      %114 = vector.broadcast %cst_79 : f32 to vector<1x128xf32>
      %115 = arith.maximumf %113, %114 : vector<1x128xf32>
      %c0_80 = arith.constant 0 : index
      %c0_81 = arith.constant 0 : index
      %116 = vector.load %arg7[%c0_80, %c0_81] : memref<1x128xf32, #tpu.memory_space<vmem>>, vector<1x128xf32>
      %cst_82 = arith.constant 0.000000e+00 : f32
      %117 = vector.broadcast %cst_82 : f32 to vector<1x128xf32>
      %118 = arith.cmpf ogt, %116, %117 : vector<1x128xf32>
      %c0_83 = arith.constant 0 : index
      %c0_84 = arith.constant 0 : index
      %119 = vector.load %arg9[%c0_83, %c0_84] : memref<1x128xf32, #tpu.memory_space<vmem>>, vector<1x128xf32>
      %c0_85 = arith.constant 0 : index
      %c0_86 = arith.constant 0 : index
      %120 = vector.load %arg8[%c0_85, %c0_86] : memref<1x128xf32, #tpu.memory_space<vmem>>, vector<1x128xf32>
      %c0_87 = arith.constant 0 : index
      %c0_88 = arith.constant 0 : index
      %121 = vector.load %arg8[%c0_87, %c0_88] : memref<1x128xf32, #tpu.memory_space<vmem>>, vector<1x128xf32>
      %122 = arith.mulf %120, %121 : vector<1x128xf32>
      %c0_89 = arith.constant 0 : index
      %c0_90 = arith.constant 0 : index
      %123 = vector.load %arg7[%c0_89, %c0_90] : memref<1x128xf32, #tpu.memory_space<vmem>>, vector<1x128xf32>
      %124 = arith.divf %122, %123 : vector<1x128xf32>
      %125 = arith.subf %119, %124 : vector<1x128xf32>
      %cst_91 = arith.constant 0.000000e+00 : f32
      %126 = vector.broadcast %cst_91 : f32 to vector<1x128xf32>
      %127 = arith.select %118, %125, %126 : vector<1x128xi1>, vector<1x128xf32>
      %cst_92 = arith.constant 0.000000e+00 : f32
      %128 = vector.broadcast %cst_92 : f32 to vector<1x128xf32>
      %129 = arith.maximumf %127, %128 : vector<1x128xf32>
      %130 = vector.shape_cast %115 : vector<1x128xf32> to vector<1x1x128xf32>
      %cst_93 = arith.constant dense<0.000000e+00> : vector<1xf32>
      %131 = vector.multi_reduction <add>, %130, %cst_93 [1, 2] : vector<1x1x128xf32> to vector<1xf32>
      %132 = vector.shape_cast %131 : vector<1xf32> to vector<1x1x1xf32>
      %133 = vector.extract %132[0, 0, 0] : f32 from vector<1x1x1xf32>
      %134 = arith.divf %133, %84 : f32
      %135 = math.sqrt %134 : f32
      %136 = vector.shape_cast %129 : vector<1x128xf32> to vector<1x1x128xf32>
      %cst_94 = arith.constant dense<0.000000e+00> : vector<1xf32>
      %137 = vector.multi_reduction <add>, %136, %cst_94 [1, 2] : vector<1x1x128xf32> to vector<1xf32>
      %138 = vector.shape_cast %137 : vector<1xf32> to vector<1x1x1xf32>
      %139 = vector.extract %138[0, 0, 0] : f32 from vector<1x1x1xf32>
      %140 = arith.divf %139, %89 : f32
      %141 = math.sqrt %140 : f32
      %c0_95 = arith.constant 0 : index
      %c0_96 = arith.constant 0 : index
      %142 = vector.load %arg10[%c0_95, %c0_96] : memref<1x128xf32, #tpu.memory_space<vmem>>, vector<1x128xf32>
      %143 = vector.shape_cast %142 : vector<1x128xf32> to vector<1x1x128xf32>
      %cst_97 = arith.constant dense<0.000000e+00> : vector<1xf32>
      %144 = vector.multi_reduction <add>, %143, %cst_97 [1, 2] : vector<1x1x128xf32> to vector<1xf32>
      %145 = vector.shape_cast %144 : vector<1xf32> to vector<1x1x1xf32>
      %146 = vector.extract %145[0, 0, 0] : f32 from vector<1x1x1xf32>
      %c0_98 = arith.constant 0 : index
      %c0_99 = arith.constant 0 : index
      %147 = vector.load %arg11[%c0_98, %c0_99] : memref<1x128xf32, #tpu.memory_space<vmem>>, vector<1x128xf32>
      %148 = vector.shape_cast %147 : vector<1x128xf32> to vector<1x1x128xf32>
      %cst_100 = arith.constant dense<0.000000e+00> : vector<1xf32>
      %149 = vector.multi_reduction <add>, %148, %cst_100 [1, 2] : vector<1x1x128xf32> to vector<1xf32>
      %150 = vector.shape_cast %149 : vector<1xf32> to vector<1x1x1xf32>
      %151 = vector.extract %150[0, 0, 0] : f32 from vector<1x1x1xf32>
      %c0_101 = arith.constant 0 : index
      %c0_102 = arith.constant 0 : index
      %152 = vector.load %arg12[%c0_101, %c0_102] : memref<1x128xf32, #tpu.memory_space<vmem>>, vector<1x128xf32>
      %153 = vector.shape_cast %152 : vector<1x128xf32> to vector<1x1x128xf32>
      %cst_103 = arith.constant dense<0.000000e+00> : vector<1xf32>
      %154 = vector.multi_reduction <add>, %153, %cst_103 [1, 2] : vector<1x1x128xf32> to vector<1xf32>
      %155 = vector.shape_cast %154 : vector<1xf32> to vector<1x1x1xf32>
      %156 = vector.extract %155[0, 0, 0] : f32 from vector<1x1x1xf32>
      %157 = arith.mulf %101, %146 : f32
      %158 = arith.subf %156, %157 : f32
      %159 = arith.mulf %95, %151 : f32
      %160 = arith.subf %158, %159 : f32
      %cst_104 = arith.constant 9.216000e+03 : f32
      %161 = arith.mulf %cst_104, %95 : f32
      %162 = arith.mulf %161, %101 : f32
      %163 = arith.addf %160, %162 : f32
      %164 = arith.mulf %135, %141 : f32
      %cst_105 = arith.constant 9.216000e+03 : f32
      %165 = arith.mulf %164, %cst_105 : f32
      %166 = arith.divf %163, %165 : f32
      %cst_106 = arith.constant 1.000000e+00 : f32
      %167 = arith.subf %cst_106, %166 : f32
      %cst_107 = arith.constant 0.000000e+00 : f32
      %168 = arith.cmpf oeq, %141, %cst_107 : f32
      %cst_108 = arith.constant 0.000000e+00 : f32
      %169 = arith.cmpf oeq, %135, %cst_108 : f32
      %170 = arith.ori %168, %169 : i1
      %cst_109 = arith.constant 0.000000e+00 : f32
      %171 = arith.select %170, %cst_109, %167 : f32
      %c0_110 = arith.constant 0 : index
      %172 = memref.load %arg3[%c0_110] : memref<1xf32, #tpu.memory_space<smem>>
      memref.store %171, %arg3[%c0_110] : memref<1xf32, #tpu.memory_space<smem>>
    } else {
    }
    return
  }
  func.func @transform_0(%arg0: i32) -> (i32, i32) {
    %c0_i32 = arith.constant 0 : i32
    %c0_i32_0 = arith.constant 0 : i32
    return %arg0, %c0_i32 : i32, i32
  }
  func.func @transform_1(%arg0: i32) -> (i32, i32) {
    %c0_i32 = arith.constant 0 : i32
    %c0_i32_0 = arith.constant 0 : i32
    return %arg0, %c0_i32 : i32, i32
  }
  func.func @transform_2(%arg0: i32) -> i32 {
    %c0_i32 = arith.constant 0 : i32
    %c0_i32_0 = arith.constant 0 : i32
    return %c0_i32 : i32
  }
}

</mosaic_0001>

<bundles_post_ra>
// kernel: tpu_custom_call.1
= control target key start
LH: loop header
LB: loop body
LE: loop exit
PB: predicated region body
PF: predicated region fallthrough
CT: control target
= control target key end

     0   :  { %7 = vsyncpa [#allocation12], 0  ;;  %s1094_s0 = inlined_call_operand.hbm [shape: f32[72,128], index: 0, kind: input, shape index: {}]   ;;  %s1095_s1 = inlined_call_operand.hbm [shape: f32[72,128], index: 1, kind: input, shape index: {}]   ;;  %s1096_s2 = inlined_call_operand.hbm [shape: f32[1], index: 2, kind: output, shape index: {}]  }
   0x1   :  { %9 = vsyncpa [#allocation12 + $0x1], 0 }
   0x2   :  { %10 = vsyncpa [#allocation15], 0 }
   0x3   :  { %12 = vsyncpa [#allocation15 + $0x1], 0 }
   0x4   :  { %13 = vsyncpa [#allocation13], 0  ;;  %s873_s9 = smov 0   ;;  %s875_s10 = smov 0  }
   0x5   :  { %s877_s11 = smov 0   ;;  %s879_s12 = smov 0  }
   0x6 LB: > { %s892_s13 = sadd.s32 4294967295, %s846_s12   ;;  %s895_s14 = sadd.s32 1, %s846_s12   ;;  %s846_s12 = sphi %s879_s12, %s1104_s12   ;;  %s842_s11 = sphi %s877_s11, %s1103_s11   ;;  %s838_s10 = sphi %s875_s10, %s1102_s10   ;;  %s834_s9 = sphi %s873_s9, %s1101_s9  }
   0x7   : > { %s23_s15 = ssub.s32 %s846_s12, %s895_s14  ;;  %s26_s16 = sadd.s32 1, %s842_s11 }
   0x8   : > { %p24_p0 = scmp.eq.s32.totalorder %s23_s15, 0  ;;  %p33_p1 = scmp.ne.s32.totalorder %s842_s11, %s838_s10 }
   0x9   : > { %p34_p2 = scmp.eq.s32.totalorder %s846_s12, 0  ;;  %p39_p3 = scmp.ne.s32.totalorder %s838_s10, %s834_s9 }
   0xa   : > { %s905_s17 = scalar_select %p24_p0, %s842_s11, %s26_s16  }
   0xb   : > { %p907_p4 = por %p34_p2, %p33_p1  ;;  %p40_p5 = scmp.eq.s32.totalorder %s892_s13, 0 }
   0xc   : > { %p615_p7 = scmp.ge.s32.totalorder %s846_s12, 5 }
   0xd   : > { %p912_p6 = por %p40_p5, %p39_p3 }
   0xe   : > { %106 = sbr.rel (%p615_p7) target bundleno = 91 (0x5b), region = 16 }
  0x15   : > { %109 = sbr.rel (!%p907_p4) target bundleno = 56 (0x38), region = 20  ;;  %s110_s20 = sand.u32 (%p907_p4), 1, %s842_s11  }
  0x16   : > { %s617_s21 = sshll.u32 (%p907_p4), %s846_s12, 1  ;;  %s616_s22 = sshll.u32 (%p907_p4), %s110_s20, 4 }
  0x17   : > { %s116_s23 = ssub.s32 (%p907_p4), 9, %s617_s21  ;;  %s924_s26 = scalar_lea.sflag (%p907_p4), [#allocation12], %s110_s20 }
  0x18   : > { %p117_p8 = scmp.lt.s32.totalorder (%p907_p4), %s116_s23, 2  ;;  %s114_s27 = scalar_lea.vmem (%p907_p4), [#allocation11], %s616_s22 }
  0x1c   : > { %s1106_s23 = smov (!%p117_p8, %s116_s23), 2 }
  0x1d   : > { %s921_s24 = sshll.u32 %s1106_s23, 7 }
  0x1e   : > { %s121_s25 = ssub.s32 256, %s921_s24 }
  0x1f   : > { %122 = vsyncadd %s924_s26, %s121_s25  ;;  %p619_p9 = scmp.ne.s32.totalorder %s921_s24, 0  ;;  %s644_s28 = sshll.u32 %s846_s12, 8 }
  0x20   : > { %s932_s3 = scalar_lea.hbm %s1094_s0, %s644_s28  ;;  %s127_s4 = sshll.u32 %s114_s27, 4  ;;  %s934_s4 = int_to_ptr.vmem [resolvable:$true] %s127_s4 }
  0x21   : > { %s736_s5 = scalar_lea.hbm %s932_s3, %s921_s24  ;;  %s740_s8 = scalar_lea.hbm %s1094_s0, 1152 }
  0x22   : > { %p737_p10 = scmp.ne.s32.totalorder %s932_s3, %s736_s5  ;;  %p741_p13 = scmp.lt.u32.totalorder %s932_s3, %s1094_s0 }
  0x23   : > { %p742_p0 = scmp.lt.u32.totalorder %s740_s8, %s736_s5  ;;  %p744_p2 = scmp.lt.u32.totalorder %s736_s5, %s932_s3 }
  0x24   : > { %p738_p11 = pnand %p737_p10, %p619_p9 }
  0x25   : > { %p743_p1 = por %p742_p0, %p741_p13 }
  0x26   : > { %p739_p12 = pneg %p738_p11 }
  0x27   : > { %p745_p3 = por %p744_p2, %p743_p1 }
  0x29   : > { %p746_p5 = pnand %p745_p3, %p739_p12 }
  0x2b   : > { %749 = shalt.err (!%p746_p5)
}
  0x2c   : > { %s750_s16 = scalar_lea.vmem %s934_s4, %s921_s24  ;;  %s848_s20 = smov [#allocation11]  }
  0x2d   : > { %p751_p7 = scmp.ne.s32.totalorder %s934_s4, %s750_s16  ;;  %s754_s21 = sshll.u32 %s848_s20, 4  ;;  %s755_s21 = int_to_ptr.vmem [resolvable:$false] %s754_s21 }
  0x2e   : > { %s756_s22 = scalar_lea.vmem %s755_s21, 512  ;;  %p757_p11 = scmp.lt.s32.totalorder %s934_s4, %s755_s21 }
  0x2f   : > { %p752_p8 = pnand %p751_p7, %p619_p9  ;;  %p758_p13 = scmp.lt.s32.totalorder %s756_s22, %s750_s16 }
  0x31   : > { %p753_p10 = pneg %p752_p8  ;;  %p759_p0 = por %p758_p13, %p757_p11 }
  0x33   : > { %p760_p1 = pnand %p759_p0, %p753_p10 }
  0x35   : > { %763 = shalt.err (!%p760_p1)
}
  0x36   : > { %s849_s23 = smov 128   ;;  %s850_s25 = smov 8  }
  0x37   : > { %133 = dma.hbm_to_vmem [thread:$0]  (%p619_p9), %s932_s3, %s921_s24, %s934_s4, %s924_s26, %s849_s23, %s849_s23, %s850_s25  }
  0x38 PF: > { %136 = sbr.rel (!%p907_p4) target bundleno = 91 (0x5b), region = 24  ;;  %s137_s27 = sand.u32 (%p907_p4), 1, %s842_s11  }
  0x39   : > { %s624_s28 = sshll.u32 (%p907_p4), %s846_s12, 1  ;;  %s623_s29 = sshll.u32 (%p907_p4), %s137_s27, 4 }
  0x3a   : > { %s143_s30 = ssub.s32 (%p907_p4), 9, %s624_s28  ;;  %s968_s7 = scalar_lea.sflag (%p907_p4), [#allocation15], %s137_s27 }
  0x3b   : > { %p144_p12 = scmp.lt.s32.totalorder (%p907_p4), %s143_s30, 2  ;;  %s141_s24 = scalar_lea.vmem (%p907_p4), [#allocation14], %s623_s29 }
  0x3f   : > { %s1108_s30 = smov (!%p144_p12, %s143_s30), 2 }
  0x40   : > { %s965_s5 = sshll.u32 %s1108_s30, 7 }
  0x41   : > { %s148_s6 = ssub.s32 256, %s965_s5 }
  0x42   : > { %149 = vsyncadd %s968_s7, %s148_s6  ;;  %p626_p4 = scmp.ne.s32.totalorder %s965_s5, 0  ;;  %s645_s18 = sshll.u32 %s846_s12, 8 }
  0x43   : > { %s976_s4 = scalar_lea.hbm %s1095_s1, %s645_s18  ;;  %s154_s8 = sshll.u32 %s141_s24, 4  ;;  %s978_s8 = int_to_ptr.vmem [resolvable:$true] %s154_s8 }
  0x44   : > { %s764_s9 = scalar_lea.hbm %s976_s4, %s965_s5  ;;  %s768_s20 = scalar_lea.hbm %s1095_s1, 1152 }
  0x45   : > { %p765_p9 = scmp.ne.s32.totalorder %s976_s4, %s764_s9  ;;  %p769_p5 = scmp.lt.u32.totalorder %s976_s4, %s1095_s1 }
  0x46   : > { %p770_p7 = scmp.lt.u32.totalorder %s768_s20, %s764_s9  ;;  %p772_p10 = scmp.lt.u32.totalorder %s764_s9, %s976_s4 }
  0x47   : > { %p766_p2 = pnand %p765_p9, %p626_p4 }
  0x48   : > { %p771_p8 = por %p770_p7, %p769_p5 }
  0x49   : > { %p767_p3 = pneg %p766_p2 }
  0x4a   : > { %p773_p11 = por %p772_p10, %p771_p8 }
  0x4c   : > { %p774_p13 = pnand %p773_p11, %p767_p3 }
  0x4e   : > { %777 = shalt.err (!%p774_p13)
}
  0x4f   : > { %s778_s23 = scalar_lea.vmem %s978_s8, %s965_s5  ;;  %s851_s25 = smov [#allocation14]  }
  0x50   : > { %p779_p0 = scmp.ne.s32.totalorder %s978_s8, %s778_s23  ;;  %s782_s27 = sshll.u32 %s851_s25, 4  ;;  %s783_s27 = int_to_ptr.vmem [resolvable:$false] %s782_s27 }
  0x51   : > { %s784_s28 = scalar_lea.vmem %s783_s27, 512  ;;  %p785_p9 = scmp.lt.s32.totalorder %s978_s8, %s783_s27 }
  0x52   : > { %p780_p1 = pnand %p779_p0, %p626_p4  ;;  %p786_p2 = scmp.lt.s32.totalorder %s784_s28, %s778_s23 }
  0x54   : > { %p781_p12 = pneg %p780_p1  ;;  %p787_p5 = por %p786_p2, %p785_p9 }
  0x56   : > { %p788_p7 = pnand %p787_p5, %p781_p12 }
  0x58   : > { %791 = shalt.err (!%p788_p7)
}
  0x59   : > { %s852_s29 = smov 128   ;;  %s853_s30 = smov 8  }
  0x5a   : > { %160 = dma.hbm_to_vmem [thread:$0]  (%p626_p4), %s976_s4, %s965_s5, %s978_s8, %s968_s7, %s852_s29, %s852_s29, %s853_s30  }
  0x5b PF: > { %p630_p3 = scmp.ge.s32.totalorder %s846_s12, 1  ;;  %p162_p8 = scmp.lt.s32.totalorder %s846_s12, 6 }
  0x5d   : > { %p163_p10 = pnand %p630_p3, %p162_p8 }
  0x5e   : > { %s168_s6 = sand.u32 (!%p163_p10), 1, %s838_s10  }
  0x5f   : > { %166 = sbr.rel (%p163_p10) target bundleno = 645 (0x285), region = 28  ;;  %s631_s24 = sshll.u32 (!%p163_p10), %s168_s6, 4 }
  0x60   : > { %s169_s18 = scalar_lea.sflag (!%p163_p10), [#allocation12], %s168_s6  ;;  %s172_s26 = scalar_lea.vmem (!%p163_p10), [#allocation11], %s631_s24 }
  0x66   : > { %821 = dma.done.wait (%p912_p6), %s169_s18, 256  }
  0x67   : > { %823 = vsyncadd (%p912_p6), %s169_s18, 4294967040  ;;  %s178_s5 = scalar_lea.sflag [#allocation15], %s168_s6  ;;  %s181_s7 = scalar_lea.vmem [#allocation14], %s631_s24 }
  0x68   : > { %825 = dma.done.wait (%p912_p6), %s178_s5, 256  }
  0x69   : > { %827 = vsyncadd (%p912_p6), %s178_s5, 4294967040  ;;  %p633_p4 = scmp.ne.s32.totalorder %s892_s13, 0 }
  0x6a   : > { %v854_v0 = vmov (!%p633_p4), 0.0  }
  0x6b   : > { %215 = sbr.rel (%p633_p4) target bundleno = 114 (0x72), region = 40  ;;  %216 = vst [vmem:[#allocation2] sm:$0x1] (!%p633_p4), %v854_v0  ;;  %217 = vst [vmem:[#allocation3] sm:$0x1] (!%p633_p4), %v854_v0 }
  0x6c   : > { %218 = vst [vmem:[#allocation4] sm:$0x1] (!%p633_p4), %v854_v0  ;;  %219 = vst [vmem:[#allocation5] sm:$0x1] (!%p633_p4), %v854_v0 }
  0x6d   : > { %220 = vst [vmem:[#allocation6] sm:$0x1] (!%p633_p4), %v854_v0  ;;  %221 = vst [vmem:[#allocation7] sm:$0x1] (!%p633_p4), %v854_v0 }
  0x6e   : > { %222 = vst [vmem:[#allocation8] sm:$0x1] (!%p633_p4), %v854_v0  ;;  %223 = vst [vmem:[#allocation9] sm:$0x1] (!%p633_p4), %v854_v0 }
  0x6f   : > { %224 = vst [vmem:[#allocation10] sm:$0x1] (!%p633_p4), %v854_v0 }
  0x72 PF: > { %v225_v1 = vld [vmem:[%s172_s26] sm:$0xff]  ;;  %v226_v2 = vld [vmem:[%s172_s26 + $0x8] sm:$0xff]  ;;  %v229_v3 = vlaneseq  ;;  %s634_s12 = sshll.u32 %s892_s13, 4  ;;  %vm855_vm3 = vmmov 1   ;;  %v856_v14 = vmov 0.0   ;;  %p639_p6 = scmp.ne.s32.totalorder %s892_s13, 4 }
  0x73   : > { %v233_v4 = vstv %s634_s12  ;;  %vm238_vm0 = vcmp.ne.f32.partialorder %v225_v1, %v225_v1  ;;  %vm239_vm1 = vcmp.ne.f32.partialorder %v226_v2, %v226_v2  ;;  %v227_v5 = vld [vmem:[%s181_s7] sm:$0xff]  ;;  %v228_v7 = vld [vmem:[%s181_s7 + $0x8] sm:$0xff]  ;;  %vm367_vm15 = vcmask (!%p639_p6), 1040384  }
  0x74   : > { %v230_v6 = vshrl.u32 %v229_v3, 7  ;;  %vm244_vm2 = vcmp.ne.f32.partialorder %v227_v5, %v227_v5  ;;  %vm240_vm4 = vmxor %vm238_vm0, %vm855_vm3  ;;  %vm245_vm5 = vcmp.ne.f32.partialorder %v228_v7, %v228_v7 }
  0x75   : > { %vm241_vm6 = vmxor %vm239_vm1, %vm855_vm3 }
  0x76   : > { %v231_v8 = vadd.s32 8, %v230_v6  ;;  %v234_v9 = vadd.s32 %v233_v4, %v230_v6  ;;  %vm246_vm7 = vmxor %vm244_vm2, %vm855_vm3  ;;  %v330_v6 = vld [vmem:[#allocation8] sm:$0x1] }
  0x77   : > { %vm1018_vm9 = vmxor %vm245_vm5, %vm855_vm3 }
  0x78   : > { %v235_v10 = vadd.s32 %v233_v4, %v231_v8  ;;  %vm236_vm8 = vcmp.lt.s32.totalorder %v234_v9, 72  ;;  %v268_v8 = vld [vmem:[#allocation3] sm:$0x1] }
  0x79   : > { %vm242_vm10 = vmand %vm236_vm8, %vm240_vm4  ;;  %v326_v12 = vsel %vm236_vm8, %v225_v1, 0.0  ;;  %v328_v13 = vsel %vm236_vm8, %v227_v5, 0.0 }
  0x7a   : > { %vm237_vm11 = vcmp.lt.s32.totalorder %v235_v10, 72  ;;  %v635_v15 = vsel %vm242_vm10, 1.0, %v856_v14  ;;  %v250_v16 = vsel %vm242_vm10, %v225_v1, 0.0  ;;  %vm248_vm12 = vmand %vm236_vm8, %vm246_vm7  ;;  %v1022_v17 = vmul.f32 %v328_v13, %v326_v12 }
  0x7b   : > { %vm243_vm13 = vmand %vm237_vm11, %vm241_vm6  ;;  %v279_v18 = vmul.f32 %v250_v16, %v250_v16  ;;  %v637_v19 = vsel %vm248_vm12, 1.0, %v856_v14  ;;  %v252_v20 = vsel %vm248_vm12, %v227_v5, 0.0  ;;  %v1026_v21 = vsel %vm237_vm11, %v226_v2, 0.0 }
  0x7c   : > { %v636_v22 = vsel %vm243_vm13, 1.0, %v856_v14  ;;  %v251_v23 = vsel %vm243_vm13, %v226_v2, 0.0  ;;  %vm249_vm14 = vmand %vm237_vm11, %vm1018_vm9  ;;  %v315_v24 = vmul.f32 %v252_v20, %v252_v20  ;;  %v331_v25 = vadd.f32 %v1026_v21, %v326_v12 }
  0x7d   : > { %v259_v26 = vadd.f32 %v636_v22, %v635_v15  ;;  %v269_v27 = vadd.f32 %v251_v23, %v250_v16  ;;  %v280_v28 = vmul.f32 %v251_v23, %v251_v23  ;;  %v638_v29 = vsel %vm249_vm14, 1.0, %v856_v14  ;;  %v290_v16 = vld [vmem:[#allocation5] sm:$0x1]  ;;  %v304_v22 = vld [vmem:[#allocation6] sm:$0x1] }
  0x7e   : > { %v295_v30 = vadd.f32 %v638_v29, %v637_v19  ;;  %v253_v31 = vsel %vm249_vm14, %v228_v7, 0.0  ;;  %v332_v32 = vrot.slane %v331_v25, 4  ;;  %v1033_v33 = vsel %vm237_vm11, %v228_v7, 0.0  ;;  %v254_v7 = vld [vmem:[#allocation2] sm:$0x1] }
  0x7f   : > { %v260_v34 = vrot.slane %v259_v26, 4  ;;  %v270_v35 = vrot.slane %v269_v27, 4  ;;  %v281_v36 = vadd.f32 %v280_v28, %v279_v18  ;;  %v305_v37 = vadd.f32 %v253_v31, %v252_v20  ;;  %v278_v19 = vld [vmem:[#allocation4] sm:$0x1] }
  0x80   : > { %v296_v38 = vrot.slane %v295_v30, 4  ;;  %v316_v39 = vmul.f32 %v253_v31, %v253_v31  ;;  %v333_v40 = vadd.f32 %v332_v32, %v331_v25  ;;  %v341_v41 = vadd.f32 %v1033_v33, %v328_v13 }
  0x81   : > { %v261_v42 = vadd.f32 %v260_v34, %v259_v26  ;;  %v271_v43 = vadd.f32 %v270_v35, %v269_v27  ;;  %v282_v44 = vrot.slane %v281_v36, 4  ;;  %v306_v45 = vrot.slane %v305_v37, 4 }
  0x82   : > { %v297_v46 = vadd.f32 %v296_v38, %v295_v30  ;;  %v317_v47 = vadd.f32 %v316_v39, %v315_v24  ;;  %v334_v48 = vrot.slane %v333_v40, 2  ;;  %v342_v49 = vrot.slane %v341_v41, 4  ;;  %v340_v30 = vld [vmem:[#allocation9] sm:$0x1]  ;;  %v314_v38 = vld [vmem:[#allocation7] sm:$0x1] }
  0x83   : > { %v262_v50 = vrot.slane %v261_v42, 2  ;;  %v272_v51 = vrot.slane %v271_v43, 2  ;;  %v283_v52 = vadd.f32 %v282_v44, %v281_v36  ;;  %v307_v53 = vadd.f32 %v306_v45, %v305_v37 }
  0x84   : > { %v298_v54 = vrot.slane %v297_v46, 2  ;;  %v318_v55 = vrot.slane %v317_v47, 4  ;;  %v335_v56 = vadd.f32 %v334_v48, %v333_v40  ;;  %v343_v57 = vadd.f32 %v342_v49, %v341_v41 }
  0x85   : > { %v263_v58 = vadd.f32 %v262_v50, %v261_v42  ;;  %v273_v59 = vadd.f32 %v272_v51, %v271_v43  ;;  %v284_v60 = vrot.slane %v283_v52, 2  ;;  %v308_v61 = vrot.slane %v307_v53, 2 }
  0x86   : > { %v299_v62 = vadd.f32 %v298_v54, %v297_v46  ;;  %v319_v63 = vadd.f32 %v318_v55, %v317_v47  ;;  %v336_v0 = vrot.slane %v335_v56, 1  ;;  %v344_v1 = vrot.slane %v343_v57, 2 }
  0x87   : > { %v264_v2 = vrot.slane %v263_v58, 1  ;;  %v274_v3 = vrot.slane %v273_v59, 1  ;;  %v285_v4 = vadd.f32 %v284_v60, %v283_v52  ;;  %v309_v5 = vadd.f32 %v308_v61, %v307_v53 }
  0x88   : > { %v300_v9 = vrot.slane %v299_v62, 1  ;;  %v320_v10 = vrot.slane %v319_v63, 2  ;;  %v337_v11 = vadd.f32 %v336_v0, %v335_v56  ;;  %v345_v12 = vadd.f32 %v344_v1, %v343_v57 }
  0x89   : > { %v265_v13 = vadd.f32 %v264_v2, %v263_v58  ;;  %v275_v14 = vadd.f32 %v274_v3, %v273_v59  ;;  %v286_v15 = vrot.slane %v285_v4, 1  ;;  %v310_v18 = vrot.slane %v309_v5, 1 }
  0x8a   : > { %v301_v20 = vadd.f32 %v300_v9, %v299_v62  ;;  %v321_v23 = vadd.f32 %v320_v10, %v319_v63  ;;  %v338_v24 = vadd.f32 %v337_v11, %v330_v6  ;;  %v346_v25 = vrot.slane %v345_v12, 1 }
  0x8b   : > { %v266_v26 = vadd.f32 %v265_v13, %v254_v7  ;;  %v276_v27 = vadd.f32 %v275_v14, %v268_v8  ;;  %v287_v28 = vadd.f32 %v286_v15, %v285_v4  ;;  %v311_v29 = vadd.f32 %v310_v18, %v309_v5 }
  0x8c   : > { %v302_v31 = vadd.f32 %v301_v20, %v290_v16  ;;  %v322_v32 = vrot.slane %v321_v23, 1  ;;  %339 = vst [vmem:[#allocation8] sm:$0x1] %v338_v24  ;;  %v347_v34 = vadd.f32 %v346_v25, %v345_v12  ;;  %v352_v35 = vmul.f32 %v1033_v33, %v1026_v21  ;;  %v350_v33 = vld [vmem:[#allocation10] sm:$0x1] }
  0x8d   : > { %267 = vst [vmem:[#allocation2] sm:$0x1] %v266_v26  ;;  %277 = vst [vmem:[#allocation3] sm:$0x1] %v276_v27  ;;  %v288_v36 = vadd.f32 %v287_v28, %v278_v19  ;;  %v312_v37 = vadd.f32 %v311_v29, %v304_v22 }
  0x8e   : > { %303 = vst [vmem:[#allocation5] sm:$0x1] %v302_v31  ;;  %v323_v39 = vadd.f32 %v322_v32, %v321_v23  ;;  %v348_v40 = vadd.f32 %v347_v34, %v340_v30  ;;  %v353_v41 = vadd.f32 %v352_v35, %v1022_v17 }
  0x8f   : > { %289 = vst [vmem:[#allocation4] sm:$0x1] %v288_v36  ;;  %313 = vst [vmem:[#allocation6] sm:$0x1] %v312_v37 }
  0x90   : > { %v324_v42 = vadd.f32 %v323_v39, %v314_v38  ;;  %349 = vst [vmem:[#allocation9] sm:$0x1] %v348_v40  ;;  %v354_v43 = vrot.slane %v353_v41, 4 }
  0x92   : > { %325 = vst [vmem:[#allocation7] sm:$0x1] %v324_v42  ;;  %v355_v44 = vadd.f32 %v354_v43, %v353_v41 }
  0x93   : > { %v481_v8 = vld [vmem:[#allocation8] sm:$0x1] (!%p639_p6) }
  0x94   : > { %v356_v45 = vrot.slane %v355_v44, 2  ;;  %v366_v49 = vld [vmem:[#allocation2] sm:$0x1] (!%p639_p6)  ;;  %v389_v51 = vld [vmem:[#allocation3] sm:$0x1] (!%p639_p6)  ;;  %v482_v9 = vsel (!%p639_p6), %vm367_vm15, %v481_v8, 0.0 }
  0x95   : > { %v378_v17 = vld [vmem:[#allocation5] sm:$0x1] (!%p639_p6)  ;;  %v368_v50 = vsel (!%p639_p6), %vm367_vm15, %v366_v49, 0.0  ;;  %722 = vrcp.f32 (!%p639_p6), %v366_v49  ;;  %v390_v53 = vsel (!%p639_p6), %vm367_vm15, %v389_v51, 0.0  ;;  %v421_v56 = vmul.f32 (!%p639_p6), %v389_v51, %v389_v51 }
  0x96   : > { %v357_v46 = vadd.f32 %v356_v45, %v355_v44  ;;  %v404_v52 = vld [vmem:[#allocation6] sm:$0x1] (!%p639_p6)  ;;  %369 = vadd.xlane.f32.xlu0 (!%p639_p6), %v368_v50  ;;  %724 = vrcp.f32 (!%p639_p6), %v378_v17  ;;  %v379_v54 = vsel (!%p639_p6), %vm367_vm15, %v378_v17, 0.0  ;;  %391 = vadd.xlane.f32.xlu1 (!%p639_p6), %v390_v53  ;;  %v420_v59 = vld [vmem:[#allocation4] sm:$0x1] (!%p639_p6)  ;;  %vm419_vm0 = vcmp.gt.f32.partialorder (!%p639_p6), %v366_v49, 0.0 }
  0x97   : > { %v405_v55 = vsel (!%p639_p6), %vm367_vm15, %v404_v52, 0.0  ;;  %v429_v57 = vmul.f32 (!%p639_p6), %v404_v52, %v404_v52  ;;  %vm427_vm1 = vcmp.gt.f32.partialorder (!%p639_p6), %v378_v17, 0.0  ;;  %v492_v10 = vld [vmem:[#allocation9] sm:$0x1] (!%p639_p6) }
  0x98   : > { %v358_v21 = vrot.slane %v357_v46, 1  ;;  %365 = sbr.rel (%p639_p6) target bundleno = 630 (0x276), region = 44  ;;  %v493_v11 = vsel (!%p639_p6), %vm367_vm15, %v492_v10, 0.0 }
  0x99   : > { %v428_v62 = vld [vmem:[#allocation7] sm:$0x1] (!%p639_p6) }
  0x9a   : > { %v359_v47 = vadd.f32 %v358_v21, %v357_v46  ;;  %380 = vadd.xlane.f32.xlu0 (!%p639_p6), %v379_v54  ;;  %406 = vadd.xlane.f32.xlu1 (!%p639_p6), %v405_v55 }
  0x9c   : > { %v360_v48 = vadd.f32 %v359_v47, %v350_v33 }
  0x9e   : > { %361 = vst [vmem:[#allocation10] sm:$0x1] %v360_v48 }
  0x9f   : > { %v723_v58 = vpop.eup %722 }
  0xa0   : > { %v725_v60 = vpop.eup %724  ;;  %v423_v61 = vmul.f32 %v723_v58, %v421_v56 }
  0xa1   : > { %v431_v63 = vmul.f32 %v725_v60, %v429_v57 }
  0xa2   : > { %v424_v0 = vsub.f32 %v420_v59, %v423_v61 }
  0xa3   : > { %v432_v1 = vsub.f32 %v428_v62, %v431_v63 }
  0xa4   : > { %v425_v2 = vsel %vm419_vm0, %v424_v0, 0.0 }
  0xa5   : > { %v426_v3 = vmax.f32 %v425_v2, 0.0  ;;  %v433_v4 = vsel %vm427_vm1, %v432_v1, 0.0  ;;  %v503_v12 = vld [vmem:[#allocation10] sm:$0x1] }
  0xa6   : > { %v434_v5 = vmax.f32 %v433_v4, 0.0  ;;  %v504_v13 = vsel %vm367_vm15, %v503_v12, 0.0 }
  0xa7   : > { %v435_v6 = vsel %vm367_vm15, %v426_v3, 0.0 }
  0xa8   : > { %436 = vadd.xlane.f32.xlu0 %v435_v6  ;;  %v458_v7 = vsel %vm367_vm15, %v434_v5, 0.0 }
  0xa9   : > { %459 = vadd.xlane.f32.xlu1 %v458_v7 }
  0xac   : > { %483 = vadd.xlane.f32.xlu0 %v482_v9 }
  0xad   : > { %494 = vadd.xlane.f32.xlu1 %v493_v11 }
  0xb0   : > { %505 = vadd.xlane.f32.xlu0 %v504_v13 }
 0x123   : > { %v370_v14 = vpop.xlane.xlu0 %369  ;;  %v392_v16 = vpop.xlane.xlu1 %391 }
 0x124   : > { %v371_v15 = vrot.slane %v370_v14, 4  ;;  %v393_v18 = vrot.slane %v392_v16, 4 }
 0x126   : > { %v372_v19 = vadd.f32 %v371_v15, %v370_v14  ;;  %v394_v22 = vadd.f32 %v393_v18, %v392_v16 }
 0x127   : > { %v381_v20 = vpop.xlane.xlu0 %380  ;;  %v407_v38 = vpop.xlane.xlu1 %406 }
 0x128   : > { %v373_v23 = vrot.slane %v372_v19, 2  ;;  %v382_v24 = vrot.slane %v381_v20, 4  ;;  %v395_v25 = vrot.slane %v394_v22, 2  ;;  %v408_v39 = vrot.slane %v407_v38, 4 }
 0x12a   : > { %v383_v26 = vadd.f32 %v382_v24, %v381_v20  ;;  %v374_v27 = vadd.f32 %v373_v23, %v372_v19  ;;  %v396_v28 = vadd.f32 %v395_v25, %v394_v22  ;;  %v409_v41 = vadd.f32 %v408_v39, %v407_v38 }
 0x12c   : > { %v384_v29 = vrot.slane %v383_v26, 2  ;;  %v375_v30 = vrot.slane %v374_v27, 1  ;;  %v397_v31 = vrot.slane %v396_v28, 1  ;;  %v410_v43 = vrot.slane %v409_v41, 2 }
 0x12e   : > { %v376_v32 = vadd.f32 %v375_v30, %v374_v27  ;;  %v385_v34 = vadd.f32 %v384_v29, %v383_v26  ;;  %v398_v36 = vadd.f32 %v397_v31, %v396_v28  ;;  %v411_v21 = vadd.f32 %v410_v43, %v409_v41 }
 0x130   : > { %646 = vpush %v376_v32  ;;  %v386_v35 = vrot.slane %v385_v34, 1  ;;  %v412_v47 = vrot.slane %v411_v21, 1 }
 0x132   : > { %v387_v37 = vadd.f32 %v386_v35, %v385_v34  ;;  %v413_v17 = vadd.f32 %v412_v47, %v411_v21 }
 0x134   : > { %648 = vpush %v387_v37 }
 0x135   : > { %650 = vpush %v398_v36  ;;  %v437_v40 = vpop.xlane.xlu0 %436 }
 0x136   : > { %v438_v42 = vrot.slane %v437_v40, 4  ;;  %v460_v53 = vpop.xlane.xlu1 %459 }
 0x137   : > { %v461_v54 = vrot.slane %v460_v53, 4 }
 0x138   : > { %v439_v44 = vadd.f32 %v438_v42, %v437_v40 }
 0x139   : > { %v462_v55 = vadd.f32 %v461_v54, %v460_v53  ;;  %v484_v2 = vpop.xlane.xlu0 %483 }
 0x13a   : > { %v440_v46 = vrot.slane %v439_v44, 2  ;;  %v495_v3 = vpop.xlane.xlu1 %494  ;;  %v485_v5 = vrot.slane %v484_v2, 4 }
 0x13b   : > { %v463_v57 = vrot.slane %v462_v55, 2  ;;  %v496_v6 = vrot.slane %v495_v3, 4 }
 0x13c   : > { %v441_v48 = vadd.f32 %v440_v46, %v439_v44  ;;  %v486_v8 = vadd.f32 %v485_v5, %v484_v2 }
 0x13d   : > { %v464_v58 = vadd.f32 %v463_v57, %v462_v55  ;;  %v506_v4 = vpop.xlane.xlu0 %505  ;;  %v497_v9 = vadd.f32 %v496_v6, %v495_v3 }
 0x13e   : > { %v442_v50 = vrot.slane %v441_v48, 1  ;;  %v507_v7 = vrot.slane %v506_v4, 4  ;;  %v487_v12 = vrot.slane %v486_v8, 2 }
 0x13f   : > { %v465_v60 = vrot.slane %v464_v58, 1  ;;  %v498_v13 = vrot.slane %v497_v9, 2 }
 0x140   : > { %v443_v52 = vadd.f32 %v442_v50, %v441_v48  ;;  %v508_v10 = vadd.f32 %v507_v7, %v506_v4  ;;  %v488_v15 = vadd.f32 %v487_v12, %v486_v8 }
 0x141   : > { %v466_v1 = vadd.f32 %v465_v60, %v464_v58  ;;  %v499_v16 = vadd.f32 %v498_v13, %v497_v9 }
 0x142   : > { %v509_v14 = vrot.slane %v508_v10, 2  ;;  %v489_v19 = vrot.slane %v488_v15, 1 }
 0x143   : > { %v500_v20 = vrot.slane %v499_v16, 1 }
 0x144   : > { %v510_v18 = vadd.f32 %v509_v14, %v508_v10  ;;  %v490_v26 = vadd.f32 %v489_v19, %v488_v15 }
 0x145   : > { %v501_v28 = vadd.f32 %v500_v20, %v499_v16 }
 0x146   : > { %v511_v23 = vrot.slane %v510_v18, 1 }
 0x148   : > { %v512_v30 = vadd.f32 %v511_v23, %v510_v18 }
 0x161   : > { %s647_s19 = spop %646 }
 0x162   : > { %v400_v45 = vstv %s647_s19 }
 0x163   : > { %726 = vrcp.f32 %v400_v45 }
 0x165   : > { %s649_s3 = spop %648 }
 0x166   : > { %v415_v33 = vstv %s649_s3  ;;  %s651_s4 = spop %650 }
 0x167   : > { %728 = vrcp.f32 %v415_v33 }
 0x16d   : > { %v727_v49 = vpop.eup %726 }
 0x16e   : > { %652 = vpush %v727_v49 }
 0x16f   : > { %654 = vpush %v413_v17 }
 0x171   : > { %v729_v51 = vpop.eup %728 }
 0x172   : > { %656 = vpush %v729_v51 }
 0x173   : > { %658 = vpush %v443_v52 }
 0x19f   : > { %s653_s8 = spop %652 }
 0x1a0   : > { %s1049_s9 = smul.f32 %s653_s8, %s651_s4  ;;  %s655_s15 = spop %654 }
 0x1a2   : > { %s518_s16 = smul.f32 9216.0, %s1049_s9 }
 0x1a3   : > { %s1052_s20 = spop %656 }
 0x1a4   : > { %s1055_s21 = smul.f32 %s1052_s20, %s655_s15  ;;  %s659_s22 = spop %658 }
 0x1a5   : > { %s448_s23 = smul.f32 %s659_s22, %s653_s8 }
 0x1a6   : > { %s1058_s25 = smul.f32 %s518_s16, %s1055_s21 }
 0x1a7   : > { %v449_v56 = vstv %s448_s23 }
 0x1a8   : > { %730 = vrsqrt.f32 %v449_v56  ;;  %vm452_vm2 = vcmp.eq.f32.partialorder %v449_v56, inf  ;;  %v455_v62 = vand.u32 2147483648, %v449_v56  ;;  %vm454_vm3 = vcmp.eq.f32.partialorder %v449_v56, 0.0 }
 0x1b2   : > { %v731_v59 = vpop.eup %730 }
 0x1b3   : > { %v451_v61 = vmul.f32 %v731_v59, %v449_v56 }
 0x1b5   : > { %v453_v63 = vsel %vm452_vm2, %v449_v56, %v451_v61 }
 0x1b6   : > { %v456_v0 = vsel %vm454_vm3, %v455_v62, %v453_v63 }
 0x1b7   : > { %660 = vpush %v456_v0 }
 0x1b8   : > { %662 = vpush %v466_v1 }
 0x1e8   : > { %s1060_s27 = spop %660 }
 0x1e9   : > { %s663_s28 = spop %662  ;;  %p529_p13 = scmp.eq.f32.partialorder %s1060_s27, 0.0 }
 0x1ea   : > { %s471_s29 = smul.f32 %s663_s28, %s1052_s20 }
 0x1ec   : > { %v472_v11 = vstv %s471_s29 }
 0x1ed   : > { %732 = vrsqrt.f32 %v472_v11  ;;  %vm475_vm4 = vcmp.eq.f32.partialorder %v472_v11, inf  ;;  %v478_v25 = vand.u32 2147483648, %v472_v11  ;;  %vm477_vm5 = vcmp.eq.f32.partialorder %v472_v11, 0.0 }
 0x1f7   : > { %v733_v22 = vpop.eup %732 }
 0x1f8   : > { %v474_v24 = vmul.f32 %v733_v22, %v472_v11 }
 0x1fa   : > { %v476_v27 = vsel %vm475_vm4, %v472_v11, %v474_v24 }
 0x1fb   : > { %v479_v29 = vsel %vm477_vm5, %v478_v25, %v476_v27 }
 0x1fc   : > { %664 = vpush %v479_v29 }
 0x1fd   : > { %666 = vpush %v490_v26 }
 0x1fe   : > { %668 = vpush %v501_v28 }
 0x1ff   : > { %670 = vpush %v512_v30 }
 0x22d   : > { %s665_s30 = spop %664 }
 0x22e   : > { %s521_s6 = smul.f32 %s665_s30, %s1060_s27  ;;  %s667_s24 = spop %666 }
 0x22f   : > { %s514_s26 = smul.f32 %s667_s24, %s1055_s21  ;;  %s669_s5 = spop %668 }
 0x230   : > { %s522_s18 = smul.f32 9216.0, %s521_s6  ;;  %s671_s7 = spop %670 }
 0x231   : > { %s516_s12 = smul.f32 %s669_s5, %s1049_s9  ;;  %s515_s19 = ssub.f32 %s671_s7, %s514_s26 }
 0x232   : > { %v523_v31 = vstv %s522_s18  ;;  %p528_p11 = scmp.eq.f32.partialorder %s665_s30, 0.0 }
 0x233   : > { %734 = vrcp.f32 %v523_v31  ;;  %s517_s3 = ssub.f32 %s515_s19, %s516_s12 }
 0x234   : > { %p530_p0 = por %p529_p13, %p528_p11 }
 0x235   : > { %s520_s4 = sadd.f32 %s1058_s25, %s517_s3 }
 0x23d   : > { %v735_v32 = vpop.eup %734 }
 0x23e   : > { %672 = vpush %v735_v32 }
 0x26f   : > { %s673_s8 = spop %672 }
 0x270   : > { %s526_s15 = smul.f32 %s673_s8, %s520_s4 }
 0x272   : > { %s527_s16 = ssub.f32 1.0, %s526_s15 }
 0x274   : > { %s1110_s16 = smov (%p530_p0, %s527_s16), 0.0 }
 0x275   : > { %533 = sst [smem:[#allocation16]] %s1110_s16 }
 0x276 PF: > { %p680_p1 = scmp.eq.s32.totalorder %s892_s13, 4  ;;  %s792_s9 = scalar_lea.hbm %s1096_s2, 16 }
 0x277   : > { %p793_p12 = scmp.ne.s32.totalorder %s1096_s2, %s792_s9  ;;  %p798_p5 = scmp.lt.u32.totalorder %s792_s9, %s1096_s2 }
 0x279   : > { %p794_p9 = pnand %p793_p12, %p680_p1 }
 0x27b   : > { %p795_p2 = pneg %p794_p9 }
 0x27d   : > { %p800_p7 = pnand %p798_p5, %p795_p2 }
 0x27f   : > { %803 = shalt.err (!%p800_p7)
}
 0x280   : > { %s857_s28 = smov [#allocation16]  }
 0x281   : > { %677 = dma.smem_to_hbm (%p680_p1), %s857_s28, 16, %s1096_s2, [#allocation13]  }
 0x282   : > { %829 = dma.done.wait (%p680_p1), [#allocation13], 16  }
 0x283   : > { %831 = vsyncadd (%p680_p1), [#allocation13], 4294967280 }
 0x284   : > { %547 = sfence }
 0x285 PF: > { %p16_p3 = scmp.ge.s32.totalorder %s895_s14, 7   ;;  %s1101_s9 = smov %s838_s10 }
 0x286   : > { %s1102_s10 = smov %s842_s11  ;;  %s1103_s11 = smov %s905_s17 }
 0x287   : > { %s1104_s12 = smov %s895_s14  ;;  %18 = sbr.rel (!%p16_p3) target bundleno = 6 (0x6), region = 87 }
 0x28e   :  { %553 = vsyncpa [#allocation12], 1 }
 0x28f   :  { %555 = vsyncpa [#allocation12 + $0x1], 1 }
 0x290   :  { %556 = vsyncpa [#allocation15], 1 }
 0x291   :  { %558 = vsyncpa [#allocation15 + $0x1], 1 }
 0x292   :  { %559 = vsyncpa [#allocation13], 1 }
 0x293   :  { %561 = vsyncpa [#allocation13 + $0x1], 1 }

</bundles_post_ra>
